<compile_context>
chip_gen: v5e
topology: v5e:2x2
jax: 0.10.0
libtpu: 0.0.40
codegen_flags: <defaults>
</compile_context>

<pallas_src>
import jax
import jax.numpy as jnp
from jax.experimental import pallas as pl
from jax.experimental.pallas import tpu as pltpu


_CLAMP_MIN = 1e-4
_CLAMP_MAX = 1e4

# ~4 MiB blocks: 85% (2 MiB) -> 86% (4 MiB) of v6e HBM roofline, halves
# per-step (~0.35 us) overhead.  This is also the v7x cap: 4 MiB * 2 buffers
# * (in + out) = 16 MiB < v7x's 32 MiB scoped VMEM.  Do not raise.
_TARGET_BLOCK_BYTES = 4 * 1024 * 1024
# Below this, pallas_call launch overhead dominates; XLA fused elementwise wins.
_MIN_PALLAS_ELEMS = 64 * 1024
# Want >= this many grid steps on >2 MiB tensors (v7x megacore + DMA pipelining).
_MIN_GRID_STEPS = 4


def _round_up(x: int, m: int) -> int:
    return ((x + m - 1) // m) * m


def _softplus_clamp_f32(x):
    """Numerically stable softplus (matches F.softplus) + clamp, in f32."""
    xf = x.astype(jnp.float32)
    sp = jnp.maximum(xf, 0.0) + jnp.log1p(jnp.exp(-jnp.abs(xf)))
    return jnp.clip(sp, _CLAMP_MIN, _CLAMP_MAX)


def _dispact_kernel(x_ref, o_ref):
    o_ref[...] = _softplus_clamp_f32(x_ref[...]).astype(o_ref.dtype)


def _dispact_jax(x):
    """Plain-JAX path for tiny inputs / ragged tails (same math as the kernel)."""
    return _softplus_clamp_f32(x).astype(x.dtype)


def _dispact_pallas_2d(x2d: jax.Array, donate: bool) -> jax.Array:
    rows, lanes = x2d.shape
    itemsize = jnp.dtype(x2d.dtype).itemsize

    # Byte-targeted block rows (multiple of 8), constant block bytes across
    # lane-width fallbacks and dtypes.
    byte_rows = max(8, (_TARGET_BLOCK_BYTES // (lanes * itemsize)) // 8 * 8)
    block_rows = byte_rows
    if rows * lanes * itemsize > 2 * 1024 * 1024:
        # Ensure >= _MIN_GRID_STEPS steps so ("parallel",) shards across v7x's
        # 2 TensorCores and DMAs pipeline.
        block_rows = min(block_rows, _round_up(pl.cdiv(rows, _MIN_GRID_STEPS), 8))
    if block_rows >= rows:
        block_rows = rows  # full-extent block is always legal under (8,128) rule
    grid = (pl.cdiv(rows, block_rows),)  # ragged final row-block masked by Pallas

    n = rows * lanes
    cost = pl.CostEstimate(
        flops=8 * n, transcendentals=2 * n, bytes_accessed=2 * n * itemsize
    )

    extra = {}
    if donate:
        # Output reuses input HBM buffer when the caller donates x.
        extra["input_output_aliases"] = {0: 0}

    return pl.pallas_call(
        _dispact_kernel,
        out_shape=jax.ShapeDtypeStruct((rows, lanes), x2d.dtype),
        grid_spec=pltpu.PrefetchScalarGridSpec(
            num_scalar_prefetch=0,
            grid=grid,
            in_specs=[pl.BlockSpec((block_rows, lanes), lambda i: (i, 0))],
            out_specs=pl.BlockSpec((block_rows, lanes), lambda i: (i, 0)),
        ),
        compiler_params=pltpu.CompilerParams(
            dimension_semantics=("parallel",),
            # 4 MiB blocks double-buffered in+out = 16 MiB; 32 MiB leaves
            # headroom yet stays inside v7x's scoped VMEM.
            vmem_limit_bytes=32 * 1024 * 1024,
        ),
        cost_estimate=cost,
        **extra,
    )(x2d)


def disp_act(
    x: jax.Array,
    *,
    donate: bool = False,
    min_pallas_elems: int = _MIN_PALLAS_ELEMS,
) -> jax.Array:
    """clamp(softplus(x), 1e-4, 1e4) elementwise (DispAct.forward)."""
    orig_shape = x.shape
    n = x.size
    if n == 0:
        return x
    if n < min_pallas_elems:
        return _dispact_jax(x)

    flat = x.reshape(-1)
    n_aligned = (n // 128) * 128
    if n_aligned == 0:
        return _dispact_jax(x)

    # Widest lane-dense last dim dividing the 128-aligned prefix.
    lanes = 128
    for cand in (1024, 512, 256):
        if n_aligned % cand == 0:
            lanes = cand
            break

    if n_aligned == n:
        out = _dispact_pallas_2d(flat.reshape(n // lanes, lanes), donate)
        return out.reshape(orig_shape)

    # Ragged: Pallas on the aligned prefix, <=127-element tail in plain JAX.
    head = _dispact_pallas_2d(
        flat[:n_aligned].reshape(n_aligned // lanes, lanes), False
    ).reshape(-1)
    tail = _dispact_jax(flat[n_aligned:])
    return jnp.concatenate([head, tail]).reshape(orig_shape)


if __name__ == "__main__":
    key = jax.random.PRNGKey(0)
    k1, k2, k3, k4 = jax.random.split(key, 4)

    def _ref(x):
        r = jnp.clip(jax.nn.softplus(x.astype(jnp.float32)), _CLAMP_MIN, _CLAMP_MAX)
        return r.astype(x.dtype)

    # 1) Small NCHW-like input (module-typical shape) — fast path (pure JAX).
    x1 = jax.random.normal(k1, (2, 4, 16, 16), dtype=jnp.float32) * 5.0
    y1 = disp_act(x1)
    jax.block_until_ready(y1)
    assert y1.shape == x1.shape and y1.dtype == x1.dtype
    assert jnp.allclose(y1, _ref(x1), atol=1e-5, rtol=1e-5)

    # 2) Same input forced through the Pallas kernel (exercises the kernel).
    y1p = disp_act(x1, min_pallas_elems=0)
    jax.block_until_ready(y1p)
    assert jnp.allclose(y1p, _ref(x1), atol=1e-5, rtol=1e-5)

    # 3) Larger f32 activation (4 MiB) — byte-targeted blocks + multi-step grid.
    x3 = jax.random.normal(k2, (8, 32, 64, 64), dtype=jnp.float32) * 5.0
    y3 = disp_act(x3)
    jax.block_until_ready(y3)
    assert jnp.allclose(y3, _ref(x3), atol=1e-5, rtol=1e-5)

    # 4) Ragged 1D size (not a multiple of 128): Pallas prefix + plain-JAX tail.
    x4 = jax.random.normal(k3, (50000,), dtype=jnp.float32) * 5.0
    y4 = disp_act(x4, min_pallas_elems=0)
    jax.block_until_ready(y4)
    assert y4.shape == x4.shape
    assert jnp.allclose(y4, _ref(x4), atol=1e-5, rtol=1e-5)

    # 5) bf16 input through the Pallas path (native-dtype I/O, f32 compute).
    x5 = jax.random.normal(k4, (16, 64, 128), dtype=jnp.bfloat16) * 5.0
    y5 = disp_act(x5, min_pallas_elems=0)
    jax.block_until_ready(y5)
    assert y5.shape == x5.shape and y5.dtype == x5.dtype
    assert jnp.allclose(
        y5.astype(jnp.float32), _ref(x5).astype(jnp.float32), atol=2e-2, rtol=2e-2
    )

    print("KERNEL_OK")
</pallas_src>

<mosaic_0001>
module attributes {stable_mosaic.version = 11 : i64} {
  func.func @_dispact_kernel(%arg0: i32, %arg1: memref<2x1024xf32, #tpu.memory_space<vmem>>, %arg2: memref<2x1024xf32, #tpu.memory_space<vmem>>) attributes {dimension_semantics = [#tpu.dimension_semantics<parallel>], iteration_bounds = array<i64: 1>, scalar_prefetch = 0 : i64, scratch_operands = 0 : i64, tpu.core_type = #tpu.core_type<tc>, window_params = [{transform_indices = @transform_0, window_bounds = array<i64: 2, 1024>}, {transform_indices = @transform_1, window_bounds = array<i64: 2, 1024>}]} {
    %c0 = arith.constant 0 : index
    %c0_0 = arith.constant 0 : index
    %0 = vector.load %arg1[%c0, %c0_0] : memref<2x1024xf32, #tpu.memory_space<vmem>>, vector<2x1024xf32>
    %cst = arith.constant 0.000000e+00 : f32
    %1 = vector.broadcast %cst : f32 to vector<2x1024xf32>
    %2 = arith.maximumf %0, %1 : vector<2x1024xf32>
    %3 = math.absf %0 : vector<2x1024xf32>
    %cst_1 = arith.constant 0.000000e+00 : f32
    %4 = vector.broadcast %cst_1 : f32 to vector<2x1024xf32>
    %5 = arith.subf %4, %3 : vector<2x1024xf32>
    %6 = math.exp %5 : vector<2x1024xf32>
    %7 = math.log1p %6 : vector<2x1024xf32>
    %8 = arith.addf %2, %7 : vector<2x1024xf32>
    %cst_2 = arith.constant 9.99999974E-5 : f32
    %cst_3 = arith.constant 1.000000e+04 : f32
    %9 = vector.broadcast %cst_2 : f32 to vector<2x1024xf32>
    %10 = arith.maximumf %9, %8 : vector<2x1024xf32>
    %11 = vector.broadcast %cst_3 : f32 to vector<2x1024xf32>
    %12 = arith.minimumf %11, %10 : vector<2x1024xf32>
    %c0_4 = arith.constant 0 : index
    %c0_5 = arith.constant 0 : index
    %13 = vector.load %arg2[%c0_4, %c0_5] : memref<2x1024xf32, #tpu.memory_space<vmem>>, vector<2x1024xf32>
    tpu.vector_store %arg2[%c0_4, %c0_5], %12 {strides = array<i32>} : memref<2x1024xf32, #tpu.memory_space<vmem>>, vector<2x1024xf32>,
    return
  }
  func.func @transform_0(%arg0: i32) -> (i32, i32) {
    %c0_i32 = arith.constant 0 : i32
    %c0_i32_0 = arith.constant 0 : i32
    return %arg0, %c0_i32 : i32, i32
  }
  func.func @transform_1(%arg0: i32) -> (i32, i32) {
    %c0_i32 = arith.constant 0 : i32
    %c0_i32_0 = arith.constant 0 : i32
    return %arg0, %c0_i32 : i32, i32
  }
}

</mosaic_0001>

<bundles_post_ra>
// kernel: tpu_custom_call.1
= control target key start
LH: loop header
LB: loop body
LE: loop exit
PB: predicated region body
PF: predicated region fallthrough
CT: control target
= control target key end

     0   :  { %6 = vsyncpa [#allocation3], 0  ;;  %s158_s0 = inlined_call_operand.hbm [shape: f32[2,1024], index: 0, kind: input, shape index: {}]   ;;  %s159_s1 = inlined_call_operand.hbm [shape: f32[2,1024], index: 1, kind: output, shape index: {}]  }
   0x1   :  { %7 = vsyncpa [#allocation4], 0  ;;  %s13_s8 = sshll.u32 %s158_s0, 4  ;;  %s140_s9 = smov [#allocation2]   ;;  %s14_s8 = int_to_ptr.hbm [resolvable:$true] %s13_s8 }
   0x2   :  { %s15_s10 = sshll.u32 %s140_s9, 4  ;;  %s16_s10 = int_to_ptr.vmem [resolvable:$true] %s15_s10 }
   0x3   :  { %18 = dma.hbm_to_vmem [thread:$0]  %s14_s8, 256, %s16_s10, [#allocation3]  }
   0x4   :  { %136 = dma.done.wait [#allocation3], 256  }
   0x5   :  { %137 = vsyncadd [#allocation3], 4294967040  ;;  %v23_v0 = vld [vmem:[#allocation2] sm:$0xff]  ;;  %v24_v1 = vld [vmem:[#allocation2 + $0x8] sm:$0xff]  ;;  %s141_s0 = smov [#allocation5]   ;;  %s68_s14 = sshll.u32 %s159_s1, 4  ;;  %s69_s14 = int_to_ptr.hbm [resolvable:$true] %s68_s14 }
   0x6   :  { %v27_v2 = vand.u32 2147483647, %v23_v0  ;;  %v28_v3 = vand.u32 2147483647, %v24_v1  ;;  %v25_v20 = vmax.f32 %v23_v0, 0.0  ;;  %v26_v24 = vmax.f32 %v24_v1, 0.0 }
   0x7   :  { %s66_s11 = sshll.u32 %s141_s0, 4  ;;  %s67_s11 = int_to_ptr.vmem [resolvable:$true] %s66_s11 }
   0x8   :  { %v29_v4 = vsub.f32 0.0, %v27_v2  ;;  %v30_v5 = vsub.f32 0.0, %v28_v3 }
   0xa   :  { %v31_v6 = vmul.f32 1.442695, %v29_v4  ;;  %v33_v7 = vmul.f32 1.442695, %v30_v5 }
   0xc   :  { %80 = vpow2.f32 %v31_v6 }
   0xd   :  { %82 = vpow2.f32 %v33_v7 }
  0x12   :  { %v81_v8 = vpop.eup %80 }
  0x13   :  { %v83_v9 = vpop.eup %82  ;;  %v35_v10 = vadd.f32 1.0, %v81_v8  ;;  %v38_v11 = vmul.f32 -0.5, %v81_v8  ;;  %v41_v15 = vand.u32 2147483647, %v81_v8 }
  0x14   :  { %v44_v12 = vadd.f32 1.0, %v83_v9  ;;  %v47_v13 = vmul.f32 -0.5, %v83_v9  ;;  %v50_v17 = vand.u32 2147483647, %v83_v9 }
  0x15   :  { %84 = vlog2.f32 %v35_v10  ;;  %v39_v14 = vadd.f32 1.0, %v38_v11  ;;  %vm42_vm0 = vcmp.lt.f32.partialorder %v41_v15, 0.0004427343 }
  0x16   :  { %86 = vlog2.f32 %v44_v12  ;;  %v48_v16 = vadd.f32 1.0, %v47_v13  ;;  %vm51_vm1 = vcmp.lt.f32.partialorder %v50_v17, 0.0004427343 }
  0x17   :  { %v40_v18 = vmul.f32 %v81_v8, %v39_v14 }
  0x18   :  { %v49_v21 = vmul.f32 %v83_v9, %v48_v16 }
  0x1b   :  { %v85_v19 = vpop.eup %84 }
  0x1c   :  { %v87_v22 = vpop.eup %86  ;;  %v37_v23 = vmul.f32 0.6931472, %v85_v19 }
  0x1d   :  { %v46_v25 = vmul.f32 0.6931472, %v87_v22 }
  0x1e   :  { %v43_v26 = vsel %vm42_vm0, %v40_v18, %v37_v23 }
  0x1f   :  { %v53_v27 = vadd.f32 %v43_v26, %v25_v20  ;;  %v52_v28 = vsel %vm51_vm1, %v49_v21, %v46_v25 }
  0x20   :  { %v54_v29 = vadd.f32 %v52_v28, %v26_v24 }
  0x21   :  { %v55_v30 = vmax.f32 %v53_v27, 0.0001 }
  0x22   :  { %v56_v31 = vmax.f32 %v54_v29, 0.0001 }
  0x23   :  { %v57_v32 = vmin.f32 %v55_v30, 10000.0 }
  0x24   :  { %v58_v33 = vmin.f32 %v56_v31, 10000.0 }
  0x25   :  { %59 = vst [vmem:[#allocation5] sm:$0xff] %v57_v32 }
  0x26   :  { %60 = vst [vmem:[#allocation5 + $0x8] sm:$0xff] %v58_v33 }
  0x27   :  { %71 = dma.vmem_to_hbm [thread:$0]  %s67_s11, 256, %s69_s14, [#allocation4]  }
  0x28   :  { %138 = dma.done.wait [#allocation4], 256  }
  0x29   :  { %139 = vsyncadd [#allocation4], 4294967040 }
  0x2a   :  { %76 = vsyncpa [#allocation3], 1 }
  0x2b   :  { %77 = vsyncpa [#allocation4], 1 }

</bundles_post_ra>
